<compile_context>
chip_gen: v6e
topology: v6e:2x2x1
jax: 0.10.0
libtpu: 0.0.40
codegen_flags: <defaults>
</compile_context>

<pallas_src>
import jax
import jax.numpy as jnp
from jax.experimental import pallas as pl
from jax.experimental.pallas import tpu as pltpu


def _round_up(x, m):
    return (x + m - 1) // m * m


def _cdiv(a, b):
    return (a + b - 1) // b


# Route problems that fit comfortably in VMEM to the single-block path.
_SMALL_BYTES = 8 * 1024 * 1024
# Lifts v5e's 16 MiB scoped default; safely under v7x's 64 MiB physical VMEM.
_VMEM_LIMIT = 48 * 1024 * 1024


# ---------------------------------------------------------------------------
# Kernels
# ---------------------------------------------------------------------------
def _fused_matmul_bias_relu_kernel(x_ref, w_ref, b_ref, o_ref):
    """Single-K-block kernel: y = relu(x @ w + b). Used for the small path and
    for the tiled path when the whole K dimension fits one tile."""
    y = jnp.dot(x_ref[...], w_ref[...], preferred_element_type=jnp.float32)
    y = y + b_ref[...].astype(jnp.float32)
    o_ref[...] = jnp.maximum(y, 0.0).astype(o_ref.dtype)


def _fused_kloop_kernel(x_ref, w_ref, b_ref, o_ref, acc_ref):
    """K-reduction kernel: accumulator starts at the (pre-folded) bias, so the
    final-step epilogue is just ReLU + cast."""
    k = pl.program_id(2)

    @pl.when(k == 0)
    def _():
        acc_ref[...] = jnp.broadcast_to(
            b_ref[...].astype(jnp.float32), acc_ref.shape
        )

    acc_ref[...] += jnp.dot(
        x_ref[...], w_ref[...], preferred_element_type=jnp.float32
    )

    @pl.when(k == pl.num_programs(2) - 1)
    def _():
        o_ref[...] = jnp.maximum(acc_ref[...], 0.0).astype(o_ref.dtype)


# ---------------------------------------------------------------------------
# Parameter prep (one-time, outside the hot path)
# ---------------------------------------------------------------------------
def prepare_params(weight, bias, subtract_value, multiply_value, *, use_bf16=False):
    """Folds the affine epilogue into the params:
        (x @ W^T + b - s) * m == x @ (W^T * m) + (b - s) * m
    and stores the weight pre-transposed as (K, N)."""
    m = jnp.asarray(multiply_value, jnp.float32)
    s = jnp.asarray(subtract_value, jnp.float32)
    w_kn = weight.astype(jnp.float32).T * m        # (K, N), pre-scaled
    b_n = (bias.astype(jnp.float32) - s) * m       # (N,),   pre-shifted & scaled
    if use_bf16:
        w_kn = w_kn.astype(jnp.bfloat16)
    return w_kn, b_n


# ---------------------------------------------------------------------------
# Wrapper
# ---------------------------------------------------------------------------
def fused_linear_sub_mul_relu(x, w_kn, b_n, *, use_bf16=False):
    """x: (M, K); w_kn: (K, N) pre-scaled weight; b_n: (N,) pre-scaled bias."""
    M, K = x.shape
    Kw, N = w_kn.shape
    assert K == Kw
    out_dtype = jnp.float32

    if use_bf16:
        x = x.astype(jnp.bfloat16)
        w_kn = w_kn.astype(jnp.bfloat16)
    b_row = b_n.astype(jnp.float32).reshape(1, N)

    in_bytes = x.dtype.itemsize
    total_bytes = in_bytes * (M * K + K * N) + 4 * (N + M * N)
    cost = pl.CostEstimate(
        flops=2 * M * N * K,
        transcendentals=0,
        bytes_accessed=total_bytes,
    )

    # ---- Small path: whole problem fits VMEM. Full-array blocks (no (8,128)
    # divisibility requirement), single invocation, zero host-side pad/slice.
    if total_bytes <= _SMALL_BYTES:
        return pl.pallas_call(
            _fused_matmul_bias_relu_kernel,
            out_shape=jax.ShapeDtypeStruct((M, N), out_dtype),
            in_specs=[
                pl.BlockSpec(memory_space=pltpu.MemorySpace.VMEM),
                pl.BlockSpec(memory_space=pltpu.MemorySpace.VMEM),
                pl.BlockSpec(memory_space=pltpu.MemorySpace.VMEM),
            ],
            out_specs=pl.BlockSpec(memory_space=pltpu.MemorySpace.VMEM),
            compiler_params=pltpu.CompilerParams(vmem_limit_bytes=_VMEM_LIMIT),
            cost_estimate=cost,
        )(x, w_kn, b_row)

    # ---- Tiled path ----
    tm = min(512, _round_up(M, 8))
    tn = min(1024, _round_up(N, 128))
    tk = min(1024, _round_up(K, 128))

    # v7x has two TensorCores sharding the "parallel" axes: make sure there
    # are at least 2 parallel (M, N) blocks when the shape allows it.
    if _cdiv(M, tm) * _cdiv(N, tn) < 2:
        if N > 128:
            tn = max(128, _round_up(_cdiv(N, 2), 128))
        elif M > 8:
            tm = max(8, _round_up(_cdiv(M, 2), 8))

    # Only K is explicitly zero-padded: garbage in K edge blocks would corrupt
    # valid outputs.  M/N edge blocks are masked by Pallas (OOB x-rows / W-cols
    # only feed output rows/cols that are discarded on store).
    Kp = _round_up(K, tk)
    if Kp != K:
        x = jnp.pad(x, ((0, 0), (0, Kp - K)))
        w_kn = jnp.pad(w_kn, ((0, Kp - K), (0, 0)))

    grid_m, grid_n, grid_k = _cdiv(M, tm), _cdiv(N, tn), Kp // tk

    if grid_k == 1:
        # Whole K in one tile: plain dot, no accumulator scratch, no pl.when.
        return pl.pallas_call(
            _fused_matmul_bias_relu_kernel,
            out_shape=jax.ShapeDtypeStruct((M, N), out_dtype),
            grid_spec=pltpu.PrefetchScalarGridSpec(
                num_scalar_prefetch=0,
                grid=(grid_m, grid_n),
                in_specs=[
                    pl.BlockSpec((tm, Kp), lambda i, j: (i, 0)),   # x tile
                    pl.BlockSpec((Kp, tn), lambda i, j: (0, j)),   # W (K,N) tile
                    pl.BlockSpec((1, tn), lambda i, j: (0, j)),    # bias tile
                ],
                out_specs=pl.BlockSpec((tm, tn), lambda i, j: (i, j)),
            ),
            compiler_params=pltpu.CompilerParams(
                dimension_semantics=("parallel", "parallel"),
                vmem_limit_bytes=_VMEM_LIMIT,
            ),
            cost_estimate=cost,
        )(x, w_kn, b_row)

    return pl.pallas_call(
        _fused_kloop_kernel,
        out_shape=jax.ShapeDtypeStruct((M, N), out_dtype),
        grid_spec=pltpu.PrefetchScalarGridSpec(
            num_scalar_prefetch=0,
            grid=(grid_m, grid_n, grid_k),
            in_specs=[
                pl.BlockSpec((tm, tk), lambda i, j, k: (i, k)),    # x tile
                pl.BlockSpec((tk, tn), lambda i, j, k: (k, j)),    # W (K,N) tile
                pl.BlockSpec((1, tn), lambda i, j, k: (0, j)),     # bias tile
            ],
            out_specs=pl.BlockSpec((tm, tn), lambda i, j, k: (i, j)),
            scratch_shapes=[pltpu.VMEM((tm, tn), jnp.float32)],
        ),
        compiler_params=pltpu.CompilerParams(
            dimension_semantics=("parallel", "parallel", "arbitrary"),
            vmem_limit_bytes=_VMEM_LIMIT,
        ),
        cost_estimate=cost,
    )(x, w_kn, b_row)


# ---------------------------------------------------------------------------
# Self-test
# ---------------------------------------------------------------------------
if __name__ == "__main__":
    in_features = 10
    out_features = 5
    subtract_value = 2.0
    multiply_value = 1.5
    batch = 8

    key = jax.random.PRNGKey(0)
    kx, kw, kb = jax.random.split(key, 3)

    # Deterministic init mimicking nn.Linear's uniform(-1/sqrt(K), 1/sqrt(K)).
    bound = 1.0 / (in_features ** 0.5)
    weight = jax.random.uniform(
        kw, (out_features, in_features), jnp.float32, -bound, bound
    )
    bias = jax.random.uniform(kb, (out_features,), jnp.float32, -bound, bound)
    x = jax.random.normal(kx, (batch, in_features), jnp.float32)

    # One-time parameter prep (fold sub/mul, transpose).
    w_kn, b_n = prepare_params(weight, bias, subtract_value, multiply_value)

    # f32 path on the module's toy shape (small single-block kernel).
    out = jax.block_until_ready(fused_linear_sub_mul_relu(x, w_kn, b_n))
    ref = jnp.maximum(
        (x @ weight.T + bias - subtract_value) * multiply_value, 0.0
    )
    assert out.shape == (batch, out_features)
    assert jnp.allclose(out, ref, atol=1e-5, rtol=1e-5)

    # bf16 MXU path on the same shape (looser tolerance).
    out_bf16 = jax.block_until_ready(
        fused_linear_sub_mul_relu(x, w_kn, b_n, use_bf16=True)
    )
    assert jnp.allclose(out_bf16, ref, atol=2e-2, rtol=2e-2)

    # Larger shape exercising the tiled K-loop path with partial M/N edge
    # blocks (640 = 512 + 128, 1280 = 1024 + 256) and two K steps.
    M2, K2, N2 = 640, 2048, 1280
    k2x, k2w, k2b = jax.random.split(jax.random.PRNGKey(1), 3)
    weight2 = jax.random.normal(k2w, (N2, K2), jnp.float32) * 0.02
    bias2 = jax.random.normal(k2b, (N2,), jnp.float32)
    x2 = jax.random.normal(k2x, (M2, K2), jnp.float32)
    w2_kn, b2_n = prepare_params(weight2, bias2, subtract_value, multiply_value)
    out2 = jax.block_until_ready(fused_linear_sub_mul_relu(x2, w2_kn, b2_n))
    ref2 = jnp.maximum(
        (jnp.dot(x2, weight2.T, precision=jax.lax.Precision.HIGHEST)
         + bias2 - subtract_value) * multiply_value,
        0.0,
    )
    assert jnp.allclose(out2, ref2, atol=3e-2, rtol=3e-2)

    print("KERNEL_OK")
</pallas_src>

<mosaic_0001>
module attributes {stable_mosaic.version = 11 : i64} {
  func.func @_fused_matmul_bias_relu_kernel(%arg0: memref<8x10xf32, #tpu.memory_space<vmem>>, %arg1: memref<10x5xf32, #tpu.memory_space<vmem>>, %arg2: memref<1x5xf32, #tpu.memory_space<vmem>>, %arg3: memref<8x5xf32, #tpu.memory_space<vmem>>) attributes {dimension_semantics = [], scalar_prefetch = 0 : i64, scratch_operands = 0 : i64, tpu.core_type = #tpu.core_type<tc>} {
    %c0 = arith.constant 0 : index
    %c0_0 = arith.constant 0 : index
    %0 = vector.load %arg0[%c0, %c0_0] : memref<8x10xf32, #tpu.memory_space<vmem>>, vector<8x10xf32>
    %c0_1 = arith.constant 0 : index
    %c0_2 = arith.constant 0 : index
    %1 = vector.load %arg1[%c0_1, %c0_2] : memref<10x5xf32, #tpu.memory_space<vmem>>, vector<10x5xf32>
    %cst = arith.constant dense<0.000000e+00> : vector<8x5xf32>
    %2 = tpu.matmul %0, %1, %cst {dimension_numbers = #tpu.dot_dimension_numbers<[1], [0], [0], [1], [0, 0, 1, 1], [], []>} : vector<8x10xf32>, vector<10x5xf32>, vector<8x5xf32> -> vector<8x5xf32>
    %c0_3 = arith.constant 0 : index
    %c0_4 = arith.constant 0 : index
    %3 = vector.load %arg2[%c0_3, %c0_4] : memref<1x5xf32, #tpu.memory_space<vmem>>, vector<1x5xf32>
    %4 = vector.broadcast %3 : vector<1x5xf32> to vector<8x5xf32>
    %5 = arith.addf %2, %4 : vector<8x5xf32>
    %cst_5 = arith.constant 0.000000e+00 : f32
    %6 = vector.broadcast %cst_5 : f32 to vector<8x5xf32>
    %7 = arith.maximumf %5, %6 : vector<8x5xf32>
    %c0_6 = arith.constant 0 : index
    %c0_7 = arith.constant 0 : index
    %8 = vector.load %arg3[%c0_6, %c0_7] : memref<8x5xf32, #tpu.memory_space<vmem>>, vector<8x5xf32>
    tpu.vector_store %arg3[%c0_6, %c0_7], %7 {strides = array<i32>} : memref<8x5xf32, #tpu.memory_space<vmem>>, vector<8x5xf32>,
    return
  }
}

</mosaic_0001>

<bundles_post_ra>
// kernel: tpu_custom_call.1
= control target key start
LH: loop header
LB: loop body
LE: loop exit
PB: predicated region body
PF: predicated region fallthrough
CT: control target
= control target key end

     0   :  { %vm29_vm0 = vcmask 1041408   ;;  %v158_v1 = vmov 0.0   ;;  %vm159_vm1 = vmmov 0   ;;  %s196_s0 = inlined_call_operand.vmem [shape: f32[8,10], index: 0, kind: input, shape index: {}]   ;;  %s197_s1 = inlined_call_operand.vmem [shape: f32[10,5], index: 1, kind: input, shape index: {}]   ;;  %s198_s2 = inlined_call_operand.vmem [shape: f32[1,5], index: 2, kind: input, shape index: {}]   ;;  %s199_s3 = inlined_call_operand.hbm [shape: f32[8,5], index: 3, kind: output, shape index: {}]  }
   0x1   :  { %v17_v0 = vld [vmem:[%s197_s1 + $0x8] sm:$0x3]  ;;  %126 = vmatprep.subr.mxu0 %v158_v1  ;;  %v16_v2 = vld [vmem:[%s197_s1] sm:$0xff]  ;;  %130 = vmatprep.mubr.msk.f32.mxu0 %vm159_vm1, %v158_v1 }
   0x2   :  { %8 = vsyncpa [#allocation3], 0  ;;  %127 = vmatpush3.msk.msra.mxu0 %vm29_vm0, %v17_v0  ;;  %v15_v3 = vld [vmem:[%s196_s0] sm:$0xff]  ;;  %vm25_vm2 = vcmask 80896   ;;  %s160_s20 = smov [#allocation2]   ;;  %vm104_vm3 = vcmask 39936  }
   0x3   :  { %128 = vmatprep.subr.mxu0 %v158_v1  ;;  %v120_v4 = vld [vmem:[%s198_s2] ss:$0 sm:$0xff]  ;;  %s112_s21 = sshll.u32 %s160_s20, 4  ;;  %s113_s21 = int_to_ptr.vmem [resolvable:$true] %s112_s21 }
   0x4   :  { %129 = vmatpush3.msra.mxu0 %v16_v2  ;;  %s136_s1 = scalar_lea.vmem %s113_s21, 128  ;;  %p141_p1 = scmp.lt.s32.totalorder %s113_s21, %s113_s21 }
   0x5   :  { %131 = vmatmul.mubr.msk.f32.vlgmr.msra.gmra.mxu0 %vm25_vm2, %v15_v3  ;;  %p137_p0 = scmp.ne.s32.totalorder %s113_s21, %s136_s1  ;;  %p142_p2 = scmp.lt.s32.totalorder %s136_s1, %s136_s1 }
   0x7   :  { %p143_p3 = por %p142_p2, %p141_p1 }
   0x9   :  { %p144_p4 = pnand %p143_p3, %p137_p0 }
  0xc5   :  { %v99_v5 = vpop.f32.mrf.mxu0 }
  0xc6   :  { %v100_v6 = vadd.f32 %v120_v4, %v99_v5 }
  0xc7   :  { %v132_v7 = vpop.f32.mrf.mxu0 }
  0xc8   :  { %v103_v8 = vmax.f32 %v100_v6, 0.0 }
  0xca   :  { %105 = vst.msk [vmem:[#allocation2] sm:$0xff] %vm104_vm3, %v103_v8 }
  0xcb   :  { %147 = shalt.err (!%p144_p4)
}
  0xcc   :  { %115 = dma.vmem_to_hbm [thread:$0]  %s113_s21, 128, %s199_s3, [#allocation3]  }
  0xcd   :  { %156 = dma.done.wait [#allocation3], 128  }
  0xce   :  { %157 = vsyncadd [#allocation3], 4294967168 }
  0xcf   :  { %119 = vsyncpa [#allocation3], 1 }

</bundles_post_ra>
